<compile_context>
chip_gen: v5e
topology: v5e:2x2
jax: 0.10.0
libtpu: 0.0.40
codegen_flags: <defaults>
</compile_context>

<pallas_src>
import functools
import numpy as np
import jax
import jax.numpy as jnp
from jax.experimental import pallas as pl
from jax.experimental.pallas import tpu as pltpu


# ---------------------------------------------------------------------------
# Parameter setup (deterministic, matches __init__ with exp_init=True)
# ---------------------------------------------------------------------------
def make_psn_params(order: int):
    # exp_init: weight[order-1] = 1, weight[i] = weight[i+1] / 2
    w = np.ones((order,), dtype=np.float32)
    for i in range(order - 2, -1, -1):
        w[i] = w[i + 1] / 2.0
    threshold = np.float32(-1.0)
    return w, threshold


def gen_gemm_weight(w_order: np.ndarray, T: int, order: int) -> jnp.ndarray:
    """Build the [T, T] banded sliding-window weight matrix (glue, not hot path)."""
    W = np.zeros((T, T), dtype=np.float32)
    for i in range(T):
        end = i + 1
        start = max(0, i + 1 - order)
        length = min(end - start, order)
        W[i, start:end] = w_order[order - length:order]
    return jnp.asarray(W)


# ---------------------------------------------------------------------------
# Pallas kernels
# ---------------------------------------------------------------------------
def _psn_vpu_kernel(x_ref, o_ref, *, weights, neg_threshold, order,
                    compute_dtype, use_roll):
    """Small-order path: `order` VPU FMAs over time-shifted views (no MXU).

    h[t] = sum_{d=0..order-1} weights[order-1-d] * x[t-d]  (terms with t-d < 0 drop)
    spike = (h >= -threshold)
    weights / neg_threshold are baked-in Python constants.
    """
    x = x_ref[...].astype(compute_dtype)
    T = x.shape[0]
    acc = weights[order - 1] * x
    if use_roll:
        # roll uses the XLU slot; the mask is one VALU select.  Hoist the iota
        # (and the zeros) out of the d-loop.
        t_idx = jax.lax.broadcasted_iota(jnp.int32, x.shape, 0)
        zero = jnp.zeros_like(x)
        for d in range(1, order):
            shifted = pltpu.roll(x, shift=d, axis=0)      # shifted[t] = x[(t-d) % T]
            shifted = jnp.where(t_idx >= d, shifted, zero)
            acc = acc + weights[order - 1 - d] * shifted
    else:
        # Fallback for T not a multiple of the sublane tile: build the shift
        # explicitly (materializes a temporary, but stays correct).
        for d in range(1, order):
            shifted = jnp.concatenate(
                [jnp.zeros((d, x.shape[1]), compute_dtype), x[: T - d, :]], axis=0)
            acc = acc + weights[order - 1 - d] * shifted
    o_ref[...] = (acc >= neg_threshold).astype(o_ref.dtype)


def _psn_gemm_kernel(w_ref, x_ref, o_ref, *, neg_threshold):
    """Fallback MXU path for large order: spike = (W @ x >= -threshold).

    Kept in f32 so it stays bit-exact with the f32 reference.
    """
    x = x_ref[...].astype(jnp.float32)
    h = jnp.dot(w_ref[...], x, preferred_element_type=jnp.float32)
    o_ref[...] = (h >= neg_threshold).astype(o_ref.dtype)


# ---------------------------------------------------------------------------
# Wrapper
# ---------------------------------------------------------------------------
def _device_kind() -> str:
    try:
        return jax.devices()[0].device_kind.lower()
    except Exception:
        return ""


def _choose_tn(N, T, in_bytes, out_bytes, kind, vmem_limit):
    """Pick a lane-dense N-tile: big enough that per-step HBM traffic dominates
    the ~0.35us fixed grid-step overhead, VMEM-safe, generation-aware."""
    n128 = pl.cdiv(N, 128) * 128
    is_v7 = "7" in kind                       # v7x: 3.2 TB/s HBM, 2 TCs, 64 MiB VMEM
    target_step_bytes = (8 << 20) if is_v7 else (4 << 20)
    tn = pl.cdiv(max(1, target_step_bytes // max(1, T * (in_bytes + out_bytes))), 128) * 128
    # Double-buffered input + output blocks plus in-kernel f32 temps must fit VMEM.
    budget = int(vmem_limit * 0.7)
    per_col = T * (2 * in_bytes + 2 * out_bytes + 16)
    tn_fit = max(128, (budget // per_col) // 128 * 128)
    tn = max(128, min(tn, tn_fit, n128))
    # Only v7x has 2 TensorCores: make sure there are >=2 grid steps to shard.
    if is_v7 and pl.cdiv(N, tn) < 2 and n128 >= 256:
        tn = max(128, pl.cdiv(n128 // 2, 128) * 128)
    return tn


def masked_sliding_psn_forward(x_seq, w_order, threshold, order,
                               tn=None, out_dtype=None, force_gemm=False):
    T = x_seq.shape[0]
    x_flat = x_seq.reshape(T, -1)              # native dtype: no extra HBM astype pass
    N = x_flat.shape[1]
    if out_dtype is None:
        out_dtype = x_seq.dtype                # module semantics: spikes in input dtype
    out_dtype = jnp.dtype(out_dtype)

    kind = _device_kind()
    in_bytes = x_flat.dtype.itemsize
    out_bytes = out_dtype.itemsize
    vmem_limit = (48 << 20) if "7" in kind else (64 << 20)
    if tn is None:
        tn = _choose_tn(N, T, in_bytes, out_bytes, kind, vmem_limit)
    grid_n = pl.cdiv(N, tn)                    # no pad/slice: partial tail block is masked

    neg_threshold = float(-threshold)          # fold threshold into the comparison
    # bf16 in-kernel compute only when the input is bf16 and the chip has a
    # bf16 VPU (v6e/v7x); keep f32 on v5e and for f32 inputs (bit-exactness).
    if x_flat.dtype == jnp.bfloat16 and "v5" not in kind:
        compute_dtype = jnp.bfloat16
    else:
        compute_dtype = jnp.float32

    use_vpu = (order <= 16) and not force_gemm
    if use_vpu:
        kernel = functools.partial(
            _psn_vpu_kernel,
            weights=tuple(float(w) for w in np.asarray(w_order)),
            neg_threshold=neg_threshold, order=order,
            compute_dtype=compute_dtype, use_roll=(T % 8 == 0))
        extra_args = ()
        extra_specs = []
        flops = 2 * order * T * N
    else:
        kernel = functools.partial(_psn_gemm_kernel, neg_threshold=neg_threshold)
        extra_args = (gen_gemm_weight(np.asarray(w_order), T, order),)
        extra_specs = [pl.BlockSpec((T, T), lambda j: (0, 0))]   # resident in VMEM
        flops = 2 * T * T * N

    cost = pl.CostEstimate(
        flops=int(flops),
        transcendentals=0,
        bytes_accessed=int(T * N * (in_bytes + out_bytes)),
    )

    def run(semantics):
        return pl.pallas_call(
            kernel,
            out_shape=jax.ShapeDtypeStruct((T, N), out_dtype),
            grid_spec=pltpu.PrefetchScalarGridSpec(
                num_scalar_prefetch=0,
                grid=(grid_n,),
                in_specs=extra_specs + [
                    pl.BlockSpec((T, tn), lambda j: (0, j)),      # X tile (native dtype)
                ],
                out_specs=pl.BlockSpec((T, tn), lambda j: (0, j)),
            ),
            compiler_params=pltpu.CompilerParams(
                dimension_semantics=semantics,
                vmem_limit_bytes=vmem_limit,
            ),
            cost_estimate=cost,
        )(*extra_args, x_flat)

    # On v7x, shard the N grid axis across the two TensorCores; fall back to
    # plain "parallel" if CORE_PARALLEL is unavailable / rejected.
    semantics_choices = [("parallel",)]
    core_par = getattr(pltpu, "CORE_PARALLEL", None)
    if core_par is not None and "7" in kind and grid_n >= 2:
        semantics_choices.insert(0, (core_par,))

    out_flat, last_err = None, None
    for sem in semantics_choices:
        try:
            out_flat = run(sem)
            break
        except Exception as e:          # lowering/compile-time rejection -> fallback
            last_err = e
    if out_flat is None:
        raise last_err
    return out_flat.reshape(x_seq.shape)


# ---------------------------------------------------------------------------
# Pure-JAX reference (mirrors torch.addmm + heaviside forward)
# ---------------------------------------------------------------------------
def psn_reference(x_seq, w_order, threshold, order):
    T = x_seq.shape[0]
    W = gen_gemm_weight(np.asarray(w_order), T, order)
    x_flat = x_seq.reshape(T, -1).astype(jnp.float32)
    h = jnp.float32(threshold) + W @ x_flat
    return (h >= 0).astype(jnp.float32).reshape(x_seq.shape)


# TODO(synk): only the 'gemm' backend forward is implemented; the 'conv'
# backend and the surrogate function's custom backward are out of scope here.

if __name__ == "__main__":
    order = 2
    T, B, C, H, Wd = 8, 2, 4, 16, 16   # N = 2*4*16*16 = 2048
    w_order, threshold = make_psn_params(order)

    key = jax.random.PRNGKey(0)
    x_seq = jax.random.normal(key, (T, B, C, H, Wd), dtype=jnp.float32)
    ref = psn_reference(x_seq, w_order, threshold, order)

    # Small-order VPU path (default).
    out = masked_sliding_psn_forward(x_seq, w_order, threshold, order)
    out = jax.block_until_ready(out)
    np.testing.assert_allclose(np.asarray(out), np.asarray(ref), atol=1e-5)

    # MXU/GEMM fallback path (used for large order) on the same data.
    out_g = masked_sliding_psn_forward(x_seq, w_order, threshold, order,
                                       force_gemm=True)
    out_g = jax.block_until_ready(out_g)
    np.testing.assert_allclose(np.asarray(out_g), np.asarray(ref), atol=1e-5)

    # Ragged N (945, not a multiple of 128): exercises the partial tail block
    # handling without any wrapper-side pad / slice.
    x_odd = jax.random.normal(jax.random.PRNGKey(1), (T, 3, 5, 7, 9),
                              dtype=jnp.float32)
    out_o = masked_sliding_psn_forward(x_odd, w_order, threshold, order)
    out_o = jax.block_until_ready(out_o)
    ref_o = psn_reference(x_odd, w_order, threshold, order)
    np.testing.assert_allclose(np.asarray(out_o), np.asarray(ref_o), atol=1e-5)

    # Optional narrow spike output (int8) for bandwidth-bound deployments.
    out_i8 = masked_sliding_psn_forward(x_seq, w_order, threshold, order,
                                        out_dtype=jnp.int8)
    out_i8 = jax.block_until_ready(out_i8)
    np.testing.assert_allclose(np.asarray(out_i8).astype(np.float32),
                               np.asarray(ref), atol=1e-5)

    print("KERNEL_OK")
</pallas_src>

<mosaic_0001>
module attributes {stable_mosaic.version = 11 : i64} {
  func.func @_psn_vpu_kernel(%arg0: i32, %arg1: memref<8x2048xf32, #tpu.memory_space<vmem>>, %arg2: memref<8x2048xf32, #tpu.memory_space<vmem>>) attributes {dimension_semantics = [#tpu.dimension_semantics<parallel>], iteration_bounds = array<i64: 1>, scalar_prefetch = 0 : i64, scratch_operands = 0 : i64, tpu.core_type = #tpu.core_type<tc>, window_params = [{transform_indices = @transform_0, window_bounds = array<i64: 8, 2048>}, {transform_indices = @transform_1, window_bounds = array<i64: 8, 2048>}]} {
    %c0 = arith.constant 0 : index
    %c0_0 = arith.constant 0 : index
    %0 = vector.load %arg1[%c0, %c0_0] : memref<8x2048xf32, #tpu.memory_space<vmem>>, vector<8x2048xf32>
    %cst = arith.constant 1.000000e+00 : f32
    %1 = vector.broadcast %cst : f32 to vector<8x2048xf32>
    %2 = arith.mulf %1, %0 : vector<8x2048xf32>
    %3 = tpu.iota {dimensions = array<i32: 0>} : vector<8x2048xi32>
    %cst_1 = arith.constant 0.000000e+00 : f32
    %4 = vector.broadcast %cst_1 : f32 to vector<8x2048xf32>
    %c1_i32 = arith.constant 1 : i32
    %5 = tpu.dynamic_rotate %0 by %c1_i32 dim 0 : vector<8x2048xf32>, i32 -> vector<8x2048xf32>
    %c1_i32_2 = arith.constant 1 : i32
    %6 = vector.broadcast %c1_i32_2 : i32 to vector<8x2048xi32>
    %7 = arith.cmpi sge, %3, %6 : vector<8x2048xi32>
    %8 = arith.select %7, %5, %4 : vector<8x2048xi1>, vector<8x2048xf32>
    %cst_3 = arith.constant 5.000000e-01 : f32
    %9 = vector.broadcast %cst_3 : f32 to vector<8x2048xf32>
    %10 = arith.mulf %9, %8 : vector<8x2048xf32>
    %11 = arith.addf %2, %10 : vector<8x2048xf32>
    %cst_4 = arith.constant 1.000000e+00 : f32
    %12 = vector.broadcast %cst_4 : f32 to vector<8x2048xf32>
    %13 = arith.cmpf oge, %11, %12 : vector<8x2048xf32>
    %14 = arith.extui %13 : vector<8x2048xi1> to vector<8x2048xi32>
    %15 = arith.sitofp %14 : vector<8x2048xi32> to vector<8x2048xf32>
    %c0_5 = arith.constant 0 : index
    %c0_6 = arith.constant 0 : index
    %16 = vector.load %arg2[%c0_5, %c0_6] : memref<8x2048xf32, #tpu.memory_space<vmem>>, vector<8x2048xf32>
    tpu.vector_store %arg2[%c0_5, %c0_6], %15 {strides = array<i32>} : memref<8x2048xf32, #tpu.memory_space<vmem>>, vector<8x2048xf32>,
    return
  }
  func.func @transform_0(%arg0: i32) -> (i32, i32) {
    %c0_i32 = arith.constant 0 : i32
    %c0_i32_0 = arith.constant 0 : i32
    return %c0_i32, %arg0 : i32, i32
  }
  func.func @transform_1(%arg0: i32) -> (i32, i32) {
    %c0_i32 = arith.constant 0 : i32
    %c0_i32_0 = arith.constant 0 : i32
    return %c0_i32, %arg0 : i32, i32
  }
}

</mosaic_0001>

<bundles_post_ra>
// kernel: tpu_custom_call.1
= control target key start
LH: loop header
LB: loop body
LE: loop exit
PB: predicated region body
PF: predicated region fallthrough
CT: control target
= control target key end

     0   :  { %6 = vsyncpa [#allocation3], 0  ;;  %s328_s0 = inlined_call_operand.hbm [shape: f32[8,2048], index: 0, kind: input, shape index: {}]   ;;  %s329_s1 = inlined_call_operand.hbm [shape: f32[8,2048], index: 1, kind: output, shape index: {}]  }
   0x1   :  { %7 = vsyncpa [#allocation4], 0  ;;  %s13_s8 = sshll.u32 %s328_s0, 4  ;;  %s258_s9 = smov [#allocation2]   ;;  %s14_s8 = int_to_ptr.hbm [resolvable:$true] %s13_s8 }
   0x2   :  { %s15_s10 = sshll.u32 %s258_s9, 4  ;;  %s16_s10 = int_to_ptr.vmem [resolvable:$true] %s15_s10 }
   0x3   :  { %18 = dma.hbm_to_vmem [thread:$0]  %s14_s8, 2048, %s16_s10, [#allocation3]  }
   0x4   :  { %254 = dma.done.wait [#allocation3], 2048  }
   0x5   :  { %255 = vsyncadd [#allocation3], 4294965248  ;;  %v39_v0 = vlaneseq  ;;  %v23_v2 = vld [vmem:[#allocation2] sm:$0xff]  ;;  %v24_v3 = vld [vmem:[#allocation2 + $0x8] sm:$0xff]  ;;  %v259_v39 = vmov 0.0   ;;  %s260_s0 = smov [#allocation5]  }
   0x6   :  { %v25_v4 = vld [vmem:[#allocation2 + $0x10] sm:$0xff]  ;;  %v41_v5 = vrot.slane %v23_v2, 7  ;;  %v42_v6 = vrot.slane %v24_v3, 7  ;;  %v26_v8 = vld [vmem:[#allocation2 + $0x18] sm:$0xff]  ;;  %v27_v9 = vld [vmem:[#allocation2 + $0x20] sm:$0xff]  ;;  %s175_s11 = sshll.u32 %s260_s0, 4  ;;  %s176_s11 = int_to_ptr.vmem [resolvable:$true] %s175_s11 }
   0x7   :  { %v274_v1 = vshrl.u32 %v39_v0, 7  ;;  %v43_v7 = vrot.slane %v25_v4, 7  ;;  %v28_v10 = vld [vmem:[#allocation2 + $0x28] sm:$0xff]  ;;  %v44_v11 = vrot.slane %v26_v8, 7  ;;  %v45_v12 = vrot.slane %v27_v9, 7  ;;  %v29_v14 = vld [vmem:[#allocation2 + $0x30] sm:$0xff] }
   0x8   :  { %v46_v13 = vrot.slane %v28_v10, 7  ;;  %v47_v18 = vrot.slane %v29_v14, 7  ;;  %v30_v23 = vld [vmem:[#allocation2 + $0x38] sm:$0xff]  ;;  %v31_v37 = vld [vmem:[#allocation2 + $0x40] sm:$0xff]  ;;  %v32_v38 = vld [vmem:[#allocation2 + $0x48] sm:$0xff]  ;;  %s177_s14 = sshll.u32 %s329_s1, 4  ;;  %s178_s14 = int_to_ptr.hbm [resolvable:$true] %s177_s14 }
   0x9   :  { %vm57_vm0 = vcmp.ge.s32.totalorder %v274_v1, 1  ;;  %v48_v35 = vrot.slane %v30_v23, 7  ;;  %v33_v43 = vld [vmem:[#allocation2 + $0x50] sm:$0xff]  ;;  %v34_v47 = vld [vmem:[#allocation2 + $0x58] sm:$0xff]  ;;  %v49_v50 = vrot.slane %v31_v37, 7  ;;  %v50_v51 = vrot.slane %v32_v38, 7 }
   0xa   :  { %v58_v15 = vsel %vm57_vm0, %v41_v5, 0.0  ;;  %v59_v16 = vsel %vm57_vm0, %v42_v6, 0.0  ;;  %v60_v17 = vsel %vm57_vm0, %v43_v7, 0.0  ;;  %v61_v22 = vsel %vm57_vm0, %v44_v11, 0.0  ;;  %v35_v52 = vld [vmem:[#allocation2 + $0x60] sm:$0xff]  ;;  %v36_v55 = vld [vmem:[#allocation2 + $0x68] sm:$0xff] }
   0xb   :  { %v74_v19 = vmul.f32 0.5, %v58_v15  ;;  %v75_v20 = vmul.f32 0.5, %v59_v16  ;;  %v76_v21 = vmul.f32 0.5, %v60_v17  ;;  %v77_v24 = vmul.f32 0.5, %v61_v22  ;;  %v37_v60 = vld [vmem:[#allocation2 + $0x70] sm:$0xff]  ;;  %v38_v15 = vld [vmem:[#allocation2 + $0x78] sm:$0xff] }
   0xc   :  { %v62_v25 = vsel %vm57_vm0, %v45_v12, 0.0  ;;  %v63_v26 = vsel %vm57_vm0, %v46_v13, 0.0  ;;  %v64_v27 = vsel %vm57_vm0, %v47_v18, 0.0  ;;  %v65_v49 = vsel %vm57_vm0, %v48_v35, 0.0 }
   0xd   :  { %v90_v28 = vadd.f32 %v74_v19, %v23_v2  ;;  %v91_v29 = vadd.f32 %v75_v20, %v24_v3  ;;  %v92_v30 = vadd.f32 %v76_v21, %v25_v4  ;;  %v78_v31 = vmul.f32 0.5, %v62_v25 }
   0xe   :  { %v93_v32 = vadd.f32 %v77_v24, %v26_v8  ;;  %v79_v33 = vmul.f32 0.5, %v63_v26  ;;  %v80_v34 = vmul.f32 0.5, %v64_v27  ;;  %v81_v53 = vmul.f32 0.5, %v65_v49 }
   0xf   :  { %vm106_vm1 = vcmp.ge.f32.partialorder %v90_v28, 1.0  ;;  %vm107_vm2 = vcmp.ge.f32.partialorder %v91_v29, 1.0  ;;  %vm108_vm3 = vcmp.ge.f32.partialorder %v92_v30, 1.0  ;;  %v94_v36 = vadd.f32 %v78_v31, %v27_v9 }
  0x10   :  { %v187_v40 = vsel %vm106_vm1, 1.0, %v259_v39  ;;  %v188_v41 = vsel %vm107_vm2, 1.0, %v259_v39  ;;  %v189_v42 = vsel %vm108_vm3, 1.0, %v259_v39  ;;  %vm109_vm4 = vcmp.ge.f32.partialorder %v93_v32, 1.0 }
  0x11   :  { %154 = vst [vmem:[#allocation5] sm:$0xff] %v187_v40  ;;  %v190_v44 = vsel %vm109_vm4, 1.0, %v259_v39  ;;  %vm110_vm5 = vcmp.ge.f32.partialorder %v94_v36, 1.0  ;;  %v95_v45 = vadd.f32 %v79_v33, %v28_v10  ;;  %v96_v46 = vadd.f32 %v80_v34, %v29_v14 }
  0x12   :  { %155 = vst [vmem:[#allocation5 + $0x8] sm:$0xff] %v188_v41  ;;  %v191_v48 = vsel %vm110_vm5, 1.0, %v259_v39  ;;  %v51_v54 = vrot.slane %v33_v43, 7  ;;  %v66_v58 = vsel %vm57_vm0, %v49_v50, 0.0  ;;  %v67_v59 = vsel %vm57_vm0, %v50_v51, 0.0 }
  0x13   :  { %156 = vst [vmem:[#allocation5 + $0x10] sm:$0xff] %v189_v42  ;;  %vm111_vm6 = vcmp.ge.f32.partialorder %v95_v45, 1.0  ;;  %vm112_vm7 = vcmp.ge.f32.partialorder %v96_v46, 1.0  ;;  %v97_v61 = vadd.f32 %v81_v53, %v30_v23  ;;  %v82_v62 = vmul.f32 0.5, %v66_v58 }
  0x14   :  { %157 = vst [vmem:[#allocation5 + $0x18] sm:$0xff] %v190_v44  ;;  %v192_v56 = vsel %vm111_vm6, 1.0, %v259_v39  ;;  %v193_v57 = vsel %vm112_vm7, 1.0, %v259_v39  ;;  %v83_v63 = vmul.f32 0.5, %v67_v59  ;;  %v68_v0 = vsel %vm57_vm0, %v51_v54, 0.0 }
  0x15   :  { %158 = vst [vmem:[#allocation5 + $0x20] sm:$0xff] %v191_v48  ;;  %v84_v2 = vmul.f32 0.5, %v68_v0  ;;  %v52_v3 = vrot.slane %v34_v47, 7  ;;  %v53_v4 = vrot.slane %v35_v52, 7  ;;  %v54_v5 = vrot.slane %v36_v55, 7 }
  0x16   :  { %159 = vst [vmem:[#allocation5 + $0x28] sm:$0xff] %v192_v56  ;;  %vm113_vm8 = vcmp.ge.f32.partialorder %v97_v61, 1.0  ;;  %v98_v6 = vadd.f32 %v82_v62, %v31_v37  ;;  %v99_v7 = vadd.f32 %v83_v63, %v32_v38  ;;  %v55_v8 = vrot.slane %v37_v60, 7 }
  0x17   :  { %160 = vst [vmem:[#allocation5 + $0x30] sm:$0xff] %v193_v57  ;;  %v194_v9 = vsel %vm113_vm8, 1.0, %v259_v39  ;;  %v100_v10 = vadd.f32 %v84_v2, %v33_v43  ;;  %v69_v11 = vsel %vm57_vm0, %v52_v3, 0.0  ;;  %v70_v12 = vsel %vm57_vm0, %v53_v4, 0.0 }
  0x18   :  { %161 = vst [vmem:[#allocation5 + $0x38] sm:$0xff] %v194_v9  ;;  %vm114_vm9 = vcmp.ge.f32.partialorder %v98_v6, 1.0  ;;  %vm115_vm10 = vcmp.ge.f32.partialorder %v99_v7, 1.0  ;;  %v85_v13 = vmul.f32 0.5, %v69_v11  ;;  %v86_v14 = vmul.f32 0.5, %v70_v12 }
  0x19   :  { %v195_v16 = vsel %vm114_vm9, 1.0, %v259_v39  ;;  %v196_v17 = vsel %vm115_vm10, 1.0, %v259_v39  ;;  %vm116_vm11 = vcmp.ge.f32.partialorder %v100_v10, 1.0  ;;  %v71_v18 = vsel %vm57_vm0, %v54_v5, 0.0 }
  0x1a   :  { %162 = vst [vmem:[#allocation5 + $0x40] sm:$0xff] %v195_v16  ;;  %v197_v19 = vsel %vm116_vm11, 1.0, %v259_v39  ;;  %v101_v20 = vadd.f32 %v85_v13, %v34_v47  ;;  %v102_v21 = vadd.f32 %v86_v14, %v35_v52  ;;  %v87_v22 = vmul.f32 0.5, %v71_v18 }
  0x1b   :  { %163 = vst [vmem:[#allocation5 + $0x48] sm:$0xff] %v196_v17  ;;  %v72_v23 = vsel %vm57_vm0, %v55_v8, 0.0  ;;  %v56_v24 = vrot.slane %v38_v15, 7 }
  0x1c   :  { %164 = vst [vmem:[#allocation5 + $0x50] sm:$0xff] %v197_v19  ;;  %vm117_vm12 = vcmp.ge.f32.partialorder %v101_v20, 1.0  ;;  %vm118_vm13 = vcmp.ge.f32.partialorder %v102_v21, 1.0  ;;  %v103_v25 = vadd.f32 %v87_v22, %v36_v55  ;;  %v88_v26 = vmul.f32 0.5, %v72_v23 }
  0x1d   :  { %v198_v27 = vsel %vm117_vm12, 1.0, %v259_v39  ;;  %v199_v28 = vsel %vm118_vm13, 1.0, %v259_v39  ;;  %v73_v29 = vsel %vm57_vm0, %v56_v24, 0.0 }
  0x1e   :  { %165 = vst [vmem:[#allocation5 + $0x58] sm:$0xff] %v198_v27  ;;  %vm119_vm14 = vcmp.ge.f32.partialorder %v103_v25, 1.0  ;;  %v104_v30 = vadd.f32 %v88_v26, %v37_v60  ;;  %v89_v31 = vmul.f32 0.5, %v73_v29 }
  0x1f   :  { %166 = vst [vmem:[#allocation5 + $0x60] sm:$0xff] %v199_v28  ;;  %v200_v32 = vsel %vm119_vm14, 1.0, %v259_v39 }
  0x20   :  { %167 = vst [vmem:[#allocation5 + $0x68] sm:$0xff] %v200_v32  ;;  %vm120_vm15 = vcmp.ge.f32.partialorder %v104_v30, 1.0  ;;  %v105_v33 = vadd.f32 %v89_v31, %v38_v15 }
  0x21   :  { %v201_v34 = vsel %vm120_vm15, 1.0, %v259_v39 }
  0x22   :  { %168 = vst [vmem:[#allocation5 + $0x70] sm:$0xff] %v201_v34  ;;  %vm121_vm0 = vcmp.ge.f32.partialorder %v105_v33, 1.0 }
  0x23   :  { %v202_v1 = vsel %vm121_vm0, 1.0, %v259_v39 }
  0x24   :  { %169 = vst [vmem:[#allocation5 + $0x78] sm:$0xff] %v202_v1 }
  0x25   :  { %180 = dma.vmem_to_hbm [thread:$0]  %s176_s11, 2048, %s178_s14, [#allocation4]  }
  0x26   :  { %256 = dma.done.wait [#allocation4], 2048  }
  0x27   :  { %257 = vsyncadd [#allocation4], 4294965248 }
  0x28   :  { %185 = vsyncpa [#allocation3], 1 }
  0x29   :  { %186 = vsyncpa [#allocation4], 1 }

</bundles_post_ra>
